<compile_context>
chip_gen: v6e
topology: v6e:2x2x1
jax: 0.10.0
libtpu: 0.0.40
codegen_flags: <defaults>
</compile_context>

<pallas_src>
import functools

import jax
import jax.numpy as jnp
from jax.experimental import pallas as pl
from jax.experimental.pallas import tpu as pltpu


def _shape_copy_kernel(dims_ref, out_ref):
    """Copy the (compile-time ndim) dims from SMEM input to SMEM output."""
    ndim = out_ref.shape[0]  # static Python int
    for i in range(ndim):
        out_ref[i] = dims_ref[i]  # pure 32-bit scalar load/store, scalar ALU only


@functools.lru_cache(maxsize=None)
def _build_shape_call(ndim: int):
    """One cached pallas_call per rank; shared across all shapes of that rank."""
    return pl.pallas_call(
        _shape_copy_kernel,
        out_shape=jax.ShapeDtypeStruct((ndim,), jnp.int32),
        # Tiny scalar data: keep both sides in SMEM (no VMEM tile, no vreg, no DMA).
        in_specs=[pl.BlockSpec(memory_space=pltpu.SMEM)],
        out_specs=pl.BlockSpec(memory_space=pltpu.SMEM),
        # Tell XLA this custom call is essentially free.
        cost_estimate=pl.CostEstimate(
            flops=0, transcendentals=0, bytes_accessed=4 * ndim
        ),
    )


def shape_op(x, *, use_pallas: bool = True):
    """Equivalent of onnx2pytorch Shape: returns tensor(x.shape) as int32."""
    static_shape = tuple(int(d) for d in x.shape)
    ndim = len(static_shape)

    # Scalar input (rank 0) or relaxed contract: return the trace-time constant.
    if ndim == 0 or not use_pallas:
        return jnp.asarray(static_shape, dtype=jnp.int32).reshape((ndim,))

    # Constant dims vector -> SMEM operand; no dependency on x's data at all.
    dims = jnp.asarray(static_shape, dtype=jnp.int32)
    return _build_shape_call(ndim)(dims)


if __name__ == "__main__":
    key = jax.random.PRNGKey(0)
    # Small NCHW-style input consistent with a conv-network tensor.
    x = jax.random.normal(key, (2, 4, 16, 16), dtype=jnp.float32)

    out = shape_op(x)
    out = jax.block_until_ready(out)

    expected = jnp.array(x.shape, dtype=jnp.int32)
    assert out.shape == (4,), f"bad output shape: {out.shape}"
    assert out.dtype == jnp.int32, f"bad output dtype: {out.dtype}"
    assert bool(jnp.all(out == expected)), f"bad values: {out} vs {expected}"

    # Second shape with the same rank: reuses the exact same cached kernel.
    y = jax.random.normal(key, (3, 5, 16, 16), dtype=jnp.float32)
    out2 = jax.block_until_ready(shape_op(y))
    assert bool(jnp.all(out2 == jnp.array(y.shape, dtype=jnp.int32))), out2

    # Rank-0 guard path (pure JAX, no Pallas).
    out0 = jax.block_until_ready(shape_op(jnp.float32(1.0)))
    assert out0.shape == (0,) and out0.dtype == jnp.int32

    print("KERNEL_OK")
</pallas_src>

<mosaic_0001>
module attributes {stable_mosaic.version = 11 : i64} {
  func.func @_shape_copy_kernel(%arg0: memref<4xi32, #tpu.memory_space<smem>>, %arg1: memref<4xi32, #tpu.memory_space<smem>>) attributes {dimension_semantics = [], scalar_prefetch = 0 : i64, scratch_operands = 0 : i64, tpu.core_type = #tpu.core_type<tc>} {
    %c0 = arith.constant 0 : index
    %0 = memref.load %arg0[%c0] : memref<4xi32, #tpu.memory_space<smem>>
    %c0_0 = arith.constant 0 : index
    %1 = memref.load %arg1[%c0_0] : memref<4xi32, #tpu.memory_space<smem>>
    memref.store %0, %arg1[%c0_0] : memref<4xi32, #tpu.memory_space<smem>>
    %c1 = arith.constant 1 : index
    %2 = memref.load %arg0[%c1] : memref<4xi32, #tpu.memory_space<smem>>
    %c1_1 = arith.constant 1 : index
    %3 = memref.load %arg1[%c1_1] : memref<4xi32, #tpu.memory_space<smem>>
    memref.store %2, %arg1[%c1_1] : memref<4xi32, #tpu.memory_space<smem>>
    %c2 = arith.constant 2 : index
    %4 = memref.load %arg0[%c2] : memref<4xi32, #tpu.memory_space<smem>>
    %c2_2 = arith.constant 2 : index
    %5 = memref.load %arg1[%c2_2] : memref<4xi32, #tpu.memory_space<smem>>
    memref.store %4, %arg1[%c2_2] : memref<4xi32, #tpu.memory_space<smem>>
    %c3 = arith.constant 3 : index
    %6 = memref.load %arg0[%c3] : memref<4xi32, #tpu.memory_space<smem>>
    %c3_3 = arith.constant 3 : index
    %7 = memref.load %arg1[%c3_3] : memref<4xi32, #tpu.memory_space<smem>>
    memref.store %6, %arg1[%c3_3] : memref<4xi32, #tpu.memory_space<smem>>
    return
  }
}

</mosaic_0001>

<bundles_post_ra>
// kernel: tpu_custom_call.1
= control target key start
LH: loop header
LB: loop body
LE: loop exit
PB: predicated region body
PF: predicated region fallthrough
CT: control target
= control target key end

     0   :  { %6 = vsyncpa [#allocation3], 0  ;;  %s89_s0 = inlined_call_operand.hbm [shape: s32[4], index: 0, kind: input, shape index: {}]   ;;  %s90_s1 = inlined_call_operand.hbm [shape: s32[4], index: 1, kind: output, shape index: {}]  }
   0x1   :  { %7 = vsyncpa [#allocation4], 0  ;;  %s71_s6 = smov [#allocation2]  }
   0x2   :  { %15 = dma.hbm_to_smem %s89_s0, 16, %s71_s6, [#allocation3]  }
   0x3   :  { %67 = dma.done.wait [#allocation3], 16  }
   0x4   :  { %68 = vsyncadd [#allocation3], 4294967280 }
   0x5   :  { %19 = sfence }
   0x6   :  { %s20_s9 = sld [smem:[#allocation2]]  ;;  %s72_s13 = smov [#allocation5]  }
   0x7   :  { %s46_s10 = sld [smem:[#allocation2 + $0x1]] }
   0x8   :  { %s47_s11 = sld [smem:[#allocation2 + $0x2]] }
   0x9   :  { %s48_s12 = sld [smem:[#allocation2 + $0x3]] }
   0xc   :  { %22 = sst [smem:[#allocation5]] %s20_s9 }
   0xd   :  { %25 = sst [smem:[#allocation5 + $0x1]] %s46_s10 }
   0xe   :  { %28 = sst [smem:[#allocation5 + $0x2]] %s47_s11 }
   0xf   :  { %31 = sst [smem:[#allocation5 + $0x3]] %s48_s12 }
  0x10   :  { %39 = dma.smem_to_hbm %s72_s13, 16, %s90_s1, [#allocation4]  }
  0x11   :  { %69 = dma.done.wait [#allocation4], 16  }
  0x12   :  { %70 = vsyncadd [#allocation4], 4294967280 }
  0x13   :  { %43 = sfence }
  0x14   :  { %44 = vsyncpa [#allocation3], 1 }
  0x15   :  { %45 = vsyncpa [#allocation4], 1 }

</bundles_post_ra>
